<compile_context>
chip_gen: v5e
topology: v5e:2x2
jax: 0.10.0
libtpu: 0.0.40
codegen_flags: <defaults>
</compile_context>

<pallas_src>
import jax
import jax.numpy as jnp
from jax.experimental import pallas as pl
from jax.experimental.pallas import tpu as pltpu


def cat_tanh_kernel(x_ref, o_ref):
    # x_ref: (B, C, L)   o_ref: (B, 3, C, L)
    # tanh(concat([x, x, x])) == concat([tanh(x)] * 3): one tanh, then replicate.
    t = jnp.tanh(x_ref[...])
    # Replicate along the dedicated replica axis (static, aligned stores; no
    # lane-offset rotates regardless of C*L).
    o_ref[:, 0] = t
    o_ref[:, 1] = t
    o_ref[:, 2] = t


def model_forward(x):
    B, C, L = x.shape
    # Emit (B, 3, C, L): y4[b, r, c, l] == x[b, c, l], whose row-major flatten
    # equals torch.cat([x, x, x], dim=1).view(-1) exactly.
    y4 = pl.pallas_call(
        cat_tanh_kernel,
        out_shape=jax.ShapeDtypeStruct((B, 3, C, L), x.dtype),
        in_specs=[pl.BlockSpec(memory_space=pltpu.MemorySpace.VMEM)],
        out_specs=pl.BlockSpec(memory_space=pltpu.MemorySpace.VMEM),
    )(x)
    # The module's contract is a flat vector; this final view is the only
    # wrapper-side reshape left (fold into the consumer where possible).
    return y4.reshape(-1)


if __name__ == "__main__":
    key = jax.random.PRNGKey(0)
    x = jax.random.normal(key, (2, 3, 4), dtype=jnp.float32)

    out = model_forward(x)
    jax.block_until_ready(out)

    # Pure-JAX reference of the PyTorch semantics.
    ref = jnp.tanh(jnp.concatenate([x, x, x], axis=1).reshape(-1))
    assert out.shape == (2 * 9 * 4,)
    assert jnp.allclose(out, ref, atol=1e-6, rtol=1e-6)

    print("KERNEL_OK")
</pallas_src>

<mosaic_0001>
module attributes {stable_mosaic.version = 11 : i64} {
  func.func @cat_tanh_kernel(%arg0: memref<2x3x4xf32, #tpu.memory_space<vmem>>, %arg1: memref<2x3x3x4xf32, #tpu.memory_space<vmem>>) attributes {dimension_semantics = [], scalar_prefetch = 0 : i64, scratch_operands = 0 : i64, tpu.core_type = #tpu.core_type<tc>} {
    %c0 = arith.constant 0 : index
    %c0_0 = arith.constant 0 : index
    %c0_1 = arith.constant 0 : index
    %0 = vector.load %arg0[%c0, %c0_0, %c0_1] : memref<2x3x4xf32, #tpu.memory_space<vmem>>, vector<2x3x4xf32>
    %1 = math.tanh %0 : vector<2x3x4xf32>
    %c0_2 = arith.constant 0 : index
    %c0_3 = arith.constant 0 : index
    %c0_4 = arith.constant 0 : index
    %c0_5 = arith.constant 0 : index
    %2 = vector.load %arg1[%c0_2, %c0_3, %c0_4, %c0_5] : memref<2x3x3x4xf32, #tpu.memory_space<vmem>>, vector<2x1x3x4xf32>
    %3 = vector.shape_cast %2 : vector<2x1x3x4xf32> to vector<2x3x4xf32>
    %4 = vector.shape_cast %1 : vector<2x3x4xf32> to vector<2x1x3x4xf32>
    tpu.vector_store %arg1[%c0_2, %c0_3, %c0_4, %c0_5], %4 {strides = array<i32>} : memref<2x3x3x4xf32, #tpu.memory_space<vmem>>, vector<2x1x3x4xf32>,
    %c0_6 = arith.constant 0 : index
    %c1 = arith.constant 1 : index
    %c0_7 = arith.constant 0 : index
    %c0_8 = arith.constant 0 : index
    %5 = vector.load %arg1[%c0_6, %c1, %c0_7, %c0_8] : memref<2x3x3x4xf32, #tpu.memory_space<vmem>>, vector<2x1x3x4xf32>
    %6 = vector.shape_cast %5 : vector<2x1x3x4xf32> to vector<2x3x4xf32>
    %7 = vector.shape_cast %1 : vector<2x3x4xf32> to vector<2x1x3x4xf32>
    tpu.vector_store %arg1[%c0_6, %c1, %c0_7, %c0_8], %7 {strides = array<i32>} : memref<2x3x3x4xf32, #tpu.memory_space<vmem>>, vector<2x1x3x4xf32>,
    %c0_9 = arith.constant 0 : index
    %c2 = arith.constant 2 : index
    %c0_10 = arith.constant 0 : index
    %c0_11 = arith.constant 0 : index
    %8 = vector.load %arg1[%c0_9, %c2, %c0_10, %c0_11] : memref<2x3x3x4xf32, #tpu.memory_space<vmem>>, vector<2x1x3x4xf32>
    %9 = vector.shape_cast %8 : vector<2x1x3x4xf32> to vector<2x3x4xf32>
    %10 = vector.shape_cast %1 : vector<2x3x4xf32> to vector<2x1x3x4xf32>
    tpu.vector_store %arg1[%c0_9, %c2, %c0_10, %c0_11], %10 {strides = array<i32>} : memref<2x3x3x4xf32, #tpu.memory_space<vmem>>, vector<2x1x3x4xf32>,
    return
  }
}

</mosaic_0001>

<bundles_post_ra>
// kernel: tpu_custom_call.1
= control target key start
LH: loop header
LB: loop body
LE: loop exit
PB: predicated region body
PF: predicated region fallthrough
CT: control target
= control target key end

     0   :  { %vm12_vm0 = vcmask 26624   ;;  %s67_s0 = inlined_call_operand.vmem [shape: f32[2,3,4], index: 0, kind: input, shape index: {}]   ;;  %s68_s1 = inlined_call_operand.vmem [shape: f32[2,3,3,4], index: 1, kind: output, shape index: {}]  }
   0x1   :  { %v8_v0 = vld [vmem:[%s67_s0] sm:$0x7]  ;;  %v9_v1 = vld [vmem:[%s67_s0 + $0x4] sm:$0x7] }
   0x2   :  { %29 = vtanh.f32 %v8_v0 }
   0x3   :  { %31 = vtanh.f32 %v9_v1 }
   0x8   :  { %v30_v2 = vpop.eup %29 }
   0x9   :  { %v32_v3 = vpop.eup %31  ;;  %13 = vst.msk [vmem:[%s68_s1] sm:$0x7] %vm12_vm0, %v30_v2 }
   0xa   :  { %25 = vst.msk [vmem:[%s68_s1 + $0x4] sm:$0x7] %vm12_vm0, %v30_v2 }
   0xb   :  { %27 = vst.msk [vmem:[%s68_s1 + $0x8] sm:$0x7] %vm12_vm0, %v30_v2 }
   0xc   :  { %14 = vst.msk [vmem:[%s68_s1 + $0xc] sm:$0x7] %vm12_vm0, %v32_v3 }
   0xd   :  { %26 = vst.msk [vmem:[%s68_s1 + $0x10] sm:$0x7] %vm12_vm0, %v32_v3 }
   0xe   :  { %28 = vst.msk [vmem:[%s68_s1 + $0x14] sm:$0x7] %vm12_vm0, %v32_v3 }

</bundles_post_ra>
